<compile_context>
chip_gen: v6e
topology: v6e:2x2x1
jax: 0.10.0
libtpu: 0.0.40
codegen_flags: <defaults>
</compile_context>

<pallas_src>
import functools
import math

import jax
import jax.numpy as jnp
from jax.experimental import pallas as pl
from jax.experimental.pallas import tpu as pltpu


def _round_up(x, m):
    return ((x + m - 1) // m) * m


def _vmem_capacity_bytes():
    """Per-core VMEM capacity; conservative fallback if the query fails."""
    try:
        return int(pltpu.get_tpu_info().vmem_capacity_bytes)
    except Exception:
        return 64 * 1024 * 1024  # v7x per-TensorCore VMEM (smallest generation)


# -----------------------------------------------------------------------------
# Path A: LUT resident in VMEM + one-hot MXU gather (small / medium vocab).
# -----------------------------------------------------------------------------
def _onehot_embed_kernel(ids_ref, lut_hi_ref, lut_lo_ref, out_ref, *,
                         scale, vocab):
    # ids_ref: (T, 1) int32 token ids for this block.
    # lut_hi/lut_lo: (vocab, d_model) bf16 hi/lo split of the f32 table,
    #                resident in VMEM (constant index_map, single-buffered).
    ids = ids_ref[...]                                               # (T, 1)
    col = jax.lax.broadcasted_iota(jnp.int32, (ids.shape[0], vocab), 1)
    onehot = (ids == col).astype(jnp.bfloat16)                       # {0,1} bf16
    # Two 1-pass bf16 matmuls (DEFAULT precision) reconstruct the f32 table to
    # ~2^-18 relative error; the sqrt(d_model) scale is applied on the f32
    # accumulator so it is never rounded to bf16.
    acc = jnp.dot(onehot, lut_hi_ref[...], preferred_element_type=jnp.float32)
    acc = acc + jnp.dot(onehot, lut_lo_ref[...],
                        preferred_element_type=jnp.float32)
    out_ref[...] = (acc * scale).astype(out_ref.dtype)


# -----------------------------------------------------------------------------
# Path B: large-vocab fallback — batched manual DMA row gather from HBM.
# -----------------------------------------------------------------------------
def _dma_gather_kernel(ids_ref, lut_hbm, out_ref, rows_vmem, sems, *,
                       scale, rows_per_step):
    base = pl.program_id(0) * rows_per_step
    # Issue all row fetches for this block so they are in flight together.
    for r in range(rows_per_step):
        row = ids_ref[base + r]
        pltpu.make_async_copy(lut_hbm.at[pl.ds(row, 1)],
                              rows_vmem.at[pl.ds(r, 1)],
                              sems.at[r]).start()
    for r in range(rows_per_step):
        row = ids_ref[base + r]
        pltpu.make_async_copy(lut_hbm.at[pl.ds(row, 1)],
                              rows_vmem.at[pl.ds(r, 1)],
                              sems.at[r]).wait()
    out_ref[...] = (rows_vmem[...] * scale).astype(out_ref.dtype)


def embeddings_forward(x_ids, lut, *, block_tokens=None, max_onehot_vocab=4096,
                       rows_per_step=16):
    """Pallas equivalent of Embeddings.forward: lut[x] * sqrt(d_model)."""
    vocab, d_model = lut.shape
    scale = math.sqrt(d_model)
    out_dtype = lut.dtype
    itemsize = jnp.dtype(lut.dtype).itemsize

    vmem_cap = _vmem_capacity_bytes()
    if block_tokens is None:
        # 128 MiB-VMEM parts (v5e/v6e) can afford larger token blocks; keep 256
        # on 64 MiB v7x.
        block_tokens = 512 if vmem_cap >= 96 * 1024 * 1024 else 256

    flat_ids = x_ids.reshape(-1).astype(jnp.int32)
    n_tokens = flat_ids.shape[0]

    # bf16 hi/lo split of the table for the one-hot path (2 x bf16 == 1 x f32
    # bytes), single-buffered resident.
    lut_resident_bytes = 2 * vocab * d_model * 2
    # Generation-aware residency budget: ~51 MiB on 128 MiB VMEM (v5e/v6e),
    # ~25 MiB on 64 MiB VMEM (v7x).
    resident_budget = int(0.4 * vmem_cap)

    use_onehot = (vocab <= max_onehot_vocab
                  and lut_resident_bytes <= resident_budget)

    if use_onehot:
        # NOTE: an out-of-range id produces an all-zero one-hot row (zero
        # output) instead of raising like nn.Embedding; no OOB access is
        # possible on this path, so no clamp is needed.
        t = _round_up(min(block_tokens, _round_up(n_tokens, 8)), 8)
        n_pad = _round_up(n_tokens, t)
        ids_col = jnp.pad(flat_ids, (0, n_pad - n_tokens)).reshape(n_pad, 1)
        n_blocks = n_pad // t

        lut_f32 = lut.astype(jnp.float32)
        lut_hi = lut_f32.astype(jnp.bfloat16)
        lut_lo = (lut_f32 - lut_hi.astype(jnp.float32)).astype(jnp.bfloat16)

        vmem_needed = (
            lut_resident_bytes               # resident hi/lo tables (1x each)
            + 2 * t * 4                      # ids blocks (double-buffered)
            + 2 * t * d_model * itemsize     # output blocks (double-buffered)
            + t * vocab * 2                  # one-hot temporary (bf16)
            + 2 * t * d_model * 4            # f32 matmul accumulators
            + (4 << 20))                     # headroom
        # No 32 MiB floor; never request more than 3/4 of physical VMEM so the
        # compiler keeps scratch headroom on v7x's 64 MiB parts.
        vmem_limit = int(min(max(vmem_needed, 16 * 1024 * 1024),
                             (3 * vmem_cap) // 4))

        cost = pl.CostEstimate(
            flops=2 * 2 * n_pad * vocab * d_model,       # two bf16 passes
            transcendentals=0,
            bytes_accessed=(lut_resident_bytes
                            + n_pad * (4 + d_model * itemsize)),
        )

        out_flat = pl.pallas_call(
            functools.partial(_onehot_embed_kernel, scale=scale, vocab=vocab),
            out_shape=jax.ShapeDtypeStruct((n_pad, d_model), out_dtype),
            grid=(n_blocks,),
            in_specs=[
                pl.BlockSpec((t, 1), lambda i: (i, 0)),            # token ids
                pl.BlockSpec((vocab, d_model), lambda i: (0, 0),   # resident hi
                             pipeline_mode=pl.Buffered(1)),
                pl.BlockSpec((vocab, d_model), lambda i: (0, 0),   # resident lo
                             pipeline_mode=pl.Buffered(1)),
            ],
            out_specs=pl.BlockSpec((t, d_model), lambda i: (i, 0)),
            compiler_params=pltpu.CompilerParams(
                dimension_semantics=("parallel",),    # 2 TensorCores on v7x
                vmem_limit_bytes=vmem_limit),
            cost_estimate=cost,
        )(ids_col, lut_hi, lut_lo)
        out_flat = out_flat[:n_tokens]
    else:
        # Large-vocab fallback: scalar-prefetched ids drive R manual row DMAs
        # in flight per grid step, written as a sublane-dense (R, d_model)
        # output block.
        # nn.Embedding errors on out-of-range ids; clamp so the data-dependent
        # HBM DMA can never go out of bounds.
        safe_ids = jnp.clip(flat_ids, 0, vocab - 1)
        r_step = _round_up(min(rows_per_step, _round_up(n_tokens, 8)), 8)
        n_pad = _round_up(n_tokens, r_step)
        ids_pad = jnp.pad(safe_ids, (0, n_pad - n_tokens))
        n_steps = n_pad // r_step

        grid_spec = pltpu.PrefetchScalarGridSpec(
            num_scalar_prefetch=1,
            grid=(n_steps,),
            in_specs=[pl.BlockSpec(memory_space=pl.ANY)],      # LUT stays in HBM
            out_specs=pl.BlockSpec((r_step, d_model), lambda i, ids: (i, 0)),
            scratch_shapes=[pltpu.VMEM((r_step, d_model), lut.dtype),
                            pltpu.SemaphoreType.DMA((r_step,))],
        )
        out_flat = pl.pallas_call(
            functools.partial(_dma_gather_kernel, scale=scale,
                              rows_per_step=r_step),
            out_shape=jax.ShapeDtypeStruct((n_pad, d_model), out_dtype),
            grid_spec=grid_spec,
            compiler_params=pltpu.CompilerParams(
                dimension_semantics=("arbitrary",)),
        )(ids_pad, lut)
        out_flat = out_flat[:n_tokens]

    return out_flat.reshape(*x_ids.shape, d_model)


if __name__ == "__main__":
    key = jax.random.PRNGKey(0)
    batch, seq = 2, 8
    vocab, d_model = 64, 32

    k_ids, k_w = jax.random.split(key)
    # Integer token ids (PyTorch uses int64; int32 is the TPU-native choice).
    x = jax.random.randint(k_ids, (batch, seq), 0, vocab, dtype=jnp.int32)
    # nn.Embedding-style init: weights ~ N(0, 1).
    lut = jax.random.normal(k_w, (vocab, d_model), dtype=jnp.float32)

    # Pure-JAX reference.
    ref = lut[x] * math.sqrt(d_model)

    # Main path: resident-LUT one-hot MXU gather.
    out = jax.block_until_ready(embeddings_forward(x, lut))
    assert out.shape == (batch, seq, d_model), out.shape
    assert out.dtype == jnp.float32
    assert jnp.allclose(out, ref, atol=1e-3, rtol=1e-3), (
        float(jnp.max(jnp.abs(out - ref))))

    # Also exercise the large-vocab fallback (batched manual DMA row gather).
    out_dma = jax.block_until_ready(
        embeddings_forward(x, lut, max_onehot_vocab=0))
    assert jnp.allclose(out_dma, ref, atol=1e-3, rtol=1e-3), (
        float(jnp.max(jnp.abs(out_dma - ref))))

    print("KERNEL_OK")
</pallas_src>

<mosaic_0001>
module attributes {stable_mosaic.version = 11 : i64} {
  func.func @_onehot_embed_kernel(%arg0: i32, %arg1: memref<16x1xi32, #tpu.memory_space<vmem>>, %arg2: memref<64x32xbf16, #tpu.memory_space<vmem>>, %arg3: memref<64x32xbf16, #tpu.memory_space<vmem>>, %arg4: memref<16x32xf32, #tpu.memory_space<vmem>>) attributes {dimension_semantics = [#tpu.dimension_semantics<parallel>], iteration_bounds = array<i64: 1>, scalar_prefetch = 0 : i64, scratch_operands = 0 : i64, tpu.core_type = #tpu.core_type<tc>, window_params = [{transform_indices = @transform_0, window_bounds = array<i64: 16, 1>}, {pipeline_mode = #tpu.pipeline_mode<synchronous>, transform_indices = @transform_1, window_bounds = array<i64: 64, 32>}, {pipeline_mode = #tpu.pipeline_mode<synchronous>, transform_indices = @transform_2, window_bounds = array<i64: 64, 32>}, {transform_indices = @transform_3, window_bounds = array<i64: 16, 32>}]} {
    %c0 = arith.constant 0 : index
    %c0_0 = arith.constant 0 : index
    %0 = vector.load %arg1[%c0, %c0_0] : memref<16x1xi32, #tpu.memory_space<vmem>>, vector<16x1xi32>
    %1 = tpu.iota {dimensions = array<i32: 1>} : vector<16x64xi32>
    %2 = vector.broadcast %0 : vector<16x1xi32> to vector<16x64xi32>
    %3 = arith.cmpi eq, %2, %1 : vector<16x64xi32>
    %4 = arith.extui %3 : vector<16x64xi1> to vector<16x64xi32>
    %5 = arith.sitofp %4 : vector<16x64xi32> to vector<16x64xf32>
    %6 = arith.truncf %5 : vector<16x64xf32> to vector<16x64xbf16>
    %c0_1 = arith.constant 0 : index
    %c0_2 = arith.constant 0 : index
    %7 = vector.load %arg2[%c0_1, %c0_2] : memref<64x32xbf16, #tpu.memory_space<vmem>>, vector<64x32xbf16>
    %cst = arith.constant dense<0.000000e+00> : vector<16x32xf32>
    %8 = tpu.matmul %6, %7, %cst {dimension_numbers = #tpu.dot_dimension_numbers<[1], [0], [0], [1], [0, 0, 1, 1], [], []>} : vector<16x64xbf16>, vector<64x32xbf16>, vector<16x32xf32> -> vector<16x32xf32>
    %c0_3 = arith.constant 0 : index
    %c0_4 = arith.constant 0 : index
    %9 = vector.load %arg3[%c0_3, %c0_4] : memref<64x32xbf16, #tpu.memory_space<vmem>>, vector<64x32xbf16>
    %cst_5 = arith.constant dense<0.000000e+00> : vector<16x32xf32>
    %10 = tpu.matmul %6, %9, %cst_5 {dimension_numbers = #tpu.dot_dimension_numbers<[1], [0], [0], [1], [0, 0, 1, 1], [], []>} : vector<16x64xbf16>, vector<64x32xbf16>, vector<16x32xf32> -> vector<16x32xf32>
    %11 = arith.addf %8, %10 : vector<16x32xf32>
    %cst_6 = arith.constant 5.65685415 : f32
    %12 = vector.broadcast %cst_6 : f32 to vector<16x32xf32>
    %13 = arith.mulf %11, %12 : vector<16x32xf32>
    %c0_7 = arith.constant 0 : index
    %c0_8 = arith.constant 0 : index
    %14 = vector.load %arg4[%c0_7, %c0_8] : memref<16x32xf32, #tpu.memory_space<vmem>>, vector<16x32xf32>
    tpu.vector_store %arg4[%c0_7, %c0_8], %13 {strides = array<i32>} : memref<16x32xf32, #tpu.memory_space<vmem>>, vector<16x32xf32>,
    return
  }
  func.func @transform_0(%arg0: i32) -> (i32, i32) {
    %c0_i32 = arith.constant 0 : i32
    %c0_i32_0 = arith.constant 0 : i32
    return %arg0, %c0_i32 : i32, i32
  }
  func.func @transform_1(%arg0: i32) -> (i32, i32) {
    %c0_i32 = arith.constant 0 : i32
    %c0_i32_0 = arith.constant 0 : i32
    %c0_i32_1 = arith.constant 0 : i32
    return %c0_i32, %c0_i32_0 : i32, i32
  }
  func.func @transform_2(%arg0: i32) -> (i32, i32) {
    %c0_i32 = arith.constant 0 : i32
    %c0_i32_0 = arith.constant 0 : i32
    %c0_i32_1 = arith.constant 0 : i32
    return %c0_i32, %c0_i32_0 : i32, i32
  }
  func.func @transform_3(%arg0: i32) -> (i32, i32) {
    %c0_i32 = arith.constant 0 : i32
    %c0_i32_0 = arith.constant 0 : i32
    return %arg0, %c0_i32 : i32, i32
  }
}

</mosaic_0001>

<bundles_post_ra>
// kernel: tpu_custom_call.1
= control target key start
LH: loop header
LB: loop body
LE: loop exit
PB: predicated region body
PF: predicated region fallthrough
CT: control target
= control target key end

     0   :  { %v287_v1 = vmov 0   ;;  %v288_v3 = vmov 0.0   ;;  %vm289_vm0 = vmmov 0   ;;  %s346_s0 = inlined_call_operand.vmem [shape: s32[16,1], index: 0, kind: input, shape index: {}]   ;;  %s347_s1 = inlined_call_operand.vmem [shape: bf16[64,32], index: 1, kind: input, shape index: {}]   ;;  %s348_s2 = inlined_call_operand.vmem [shape: bf16[64,32], index: 2, kind: input, shape index: {}]   ;;  %s349_s3 = inlined_call_operand.hbm [shape: f32[16,32], index: 3, kind: output, shape index: {}]  }
   0x1   :  { %v16_v0 = vld [vmem:[%s346_s0] sm:$0xff]  ;;  %256 = vset.pattern.permute.xlu0 %v287_v1  ;;  %v17_v2 = vld [vmem:[%s346_s0 + $0x8] sm:$0xff]  ;;  %226 = vmatprep.subr.bf16.mxu0 %v288_v3  ;;  %v257_v4 = vld [vmem:[%s348_s2 + $0x18] sm:$0xff]  }
   0x2   :  { %21 = vperm.xlu0 %256, %v16_v0   ;;  %238 = vmatprep.subr.bf16.mxu1 %v288_v3  ;;  %v258_v5 = vld [vmem:[%s347_s1 + $0x18] sm:$0xff]   ;;  %v259_v6 = vld [vmem:[%s348_s2 + $0x10] sm:$0xff]   ;;  %v261_v8 = vld [vmem:[%s348_s2 + $0x8] sm:$0xff]  }
   0x3   :  { %227 = vmatpush3.bf16.msra.mxu0 %v257_v4  ;;  %239 = vmatpush3.bf16.msra.mxu1 %v258_v5  ;;  %v260_v7 = vld [vmem:[%s347_s1 + $0x10] sm:$0xff]   ;;  %v262_v9 = vld [vmem:[%s347_s1 + $0x8] sm:$0xff]  }
   0x4   :  { %228 = vmatprep.subr.bf16.mxu0 %v288_v3  ;;  %240 = vmatprep.subr.bf16.mxu1 %v288_v3 }
   0x5   :  { %234 = vmatprep.mubr.msk.bf16.mxu0 %vm289_vm0, %v288_v3  ;;  %246 = vmatprep.mubr.msk.bf16.mxu1 %vm289_vm0, %v288_v3 }
   0x6   :  { %24 = vperm.xlu0 %256, %v17_v2  }
   0x7   :  { %229 = vmatpush3.bf16.msra.mxu0 %v259_v6  ;;  %241 = vmatpush3.bf16.msra.mxu1 %v260_v7 }
   0x8   :  { %230 = vmatprep.subr.bf16.mxu0 %v288_v3 }
   0x9   :  { %8 = vsyncpa [#allocation3], 0  ;;  %242 = vmatprep.subr.bf16.mxu1 %v288_v3  ;;  %v263_v10 = vld [vmem:[%s348_s2] sm:$0xff]   ;;  %v18_v12 = vlaneseq  ;;  %vm73_vm3 = vcmask 523264   ;;  %vm185_vm4 = vcmask 261120  }
   0xa   :  { %v264_v11 = vld [vmem:[%s347_s1] sm:$0xff]   ;;  %s290_s1 = smov [#allocation2]  }
   0xb   :  { %231 = vmatpush3.bf16.msra.mxu0 %v261_v8  ;;  %243 = vmatpush3.bf16.msra.mxu1 %v262_v9  ;;  %v19_v13 = vand.u32 127, %v18_v12  ;;  %s193_s2 = sshll.u32 %s290_s1, 4  ;;  %s194_s2 = int_to_ptr.vmem [resolvable:$true] %s193_s2 }
   0xc   :  { %232 = vmatprep.subr.bf16.mxu0 %v288_v3  ;;  %244 = vmatprep.subr.bf16.mxu1 %v288_v3  ;;  %s265_s4 = scalar_lea.vmem %s194_s2, 256  ;;  %p270_p1 = scmp.lt.s32.totalorder %s194_s2, %s194_s2 }
   0xd   :  { %p266_p0 = scmp.ne.s32.totalorder %s194_s2, %s265_s4  ;;  %p271_p2 = scmp.lt.s32.totalorder %s265_s4, %s265_s4 }
   0xf   :  { %233 = vmatpush3.bf16.msra.mxu0 %v263_v10  ;;  %245 = vmatpush3.bf16.msra.mxu1 %v264_v11  ;;  %p272_p3 = por %p271_p2, %p270_p1 }
  0x11   :  { %p273_p4 = pnand %p272_p3, %p266_p0 }
  0x7d   :  { %v22_v14 = vpop.permute.xlu0 %21 }
  0x7e   :  { %vm26_vm1 = vcmp.eq.s32.totalorder %v22_v14, %v19_v13 }
  0x7f   :  { %v204_v16 = vsel %vm26_vm1, 1.0, %v288_v3 }
  0x81   :  { %v25_v15 = vpop.permute.xlu0 %24 }
  0x82   :  { %vm27_vm2 = vcmp.eq.s32.totalorder %v25_v15, %v19_v13 }
  0x83   :  { %v205_v17 = vsel %vm27_vm2, 1.0, %v288_v3 }
  0x84   :  { %v32_v18 = vpack.c.bf16 %v205_v17, %v204_v16 }
  0x86   :  { %235 = vmatmul.mubr.msk.bf16.vlgmr.msra.gmra.mxu0 %vm73_vm3, %v32_v18  ;;  %247 = vmatmul.mubr.msk.bf16.vlgmr.msra.gmra.mxu1 %vm73_vm3, %v32_v18 }
 0x146   :  { %v111_v19 = vpop.f32.mrf.mxu0  ;;  %v176_v20 = vpop.f32.mrf.mxu1 }
 0x147   :  { %v177_v21 = vadd.f32 %v176_v20, %v111_v19 }
 0x148   :  { %v236_v22 = vpop.f32.mrf.mxu0  ;;  %v248_v23 = vpop.f32.mrf.mxu1 }
 0x149   :  { %v183_v24 = vmul.f32 5.656854, %v177_v21 }
 0x14a   :  { %v114_v25 = vpop.f32.mrf.mxu0  ;;  %v179_v26 = vpop.f32.mrf.mxu1 }
 0x14b   :  { %186 = vst.msk [vmem:[#allocation2] sm:$0xff] %vm185_vm4, %v183_v24  ;;  %v180_v27 = vadd.f32 %v179_v26, %v114_v25 }
 0x14c   :  { %v237_v28 = vpop.f32.mrf.mxu0  ;;  %v249_v29 = vpop.f32.mrf.mxu1 }
 0x14d   :  { %v184_v30 = vmul.f32 5.656854, %v180_v27 }
 0x14f   :  { %187 = vst.msk [vmem:[#allocation2 + $0x8] sm:$0xff] %vm185_vm4, %v184_v30 }
 0x150   :  { %276 = shalt.err (!%p273_p4)
}
 0x151   :  { %s291_s5 = smov 128   ;;  %s292_s6 = smov 8  }
 0x152   :  { %199 = dma.vmem_to_hbm [thread:$0]  %s194_s2, 256, %s349_s3, [#allocation3], %s291_s5, %s291_s5, %s292_s6  }
 0x153   :  { %285 = dma.done.wait [#allocation3], 256  }
 0x154   :  { %286 = vsyncadd [#allocation3], 4294967040 }
 0x155   :  { %203 = vsyncpa [#allocation3], 1 }

</bundles_post_ra>
